<compile_context>
chip_gen: v7x
topology: tpu7x:2x2x1
jax: 0.10.0
libtpu: 0.0.40
codegen_flags: <defaults>
</compile_context>

<pallas_src>
import functools
import re

import jax
import jax.numpy as jnp
from jax.experimental import pallas as pl
from jax.experimental.pallas import tpu as pltpu

_LANES = 128
_MIN_BLOCKS = 4                 # prefer >= 4 grid steps when the data allows it
_SMALL_FASTPATH_BYTES = 256 * 1024


def _cdiv(a, b):
    return -(-a // b)


def _tpu_generation() -> int:
    """Best-effort TPU generation (5, 6, 7, ...); 0 if unknown."""
    try:
        kind = jax.devices()[0].device_kind.lower()
    except Exception:
        return 0
    m = re.search(r"v(\d+)", kind)
    return int(m.group(1)) if m else 0


def _lecun_kernel(x_ref, o_ref, *, compute_dtype):
    # Elementwise hot path: scale (VPU) -> tanh (EUP) -> scale (VPU).
    # TODO(synk): verify via bundle dump that jnp.tanh stays a single EUP push
    # per vreg on v7x (a VALU polynomial expansion could flip the kernel from
    # HBM-bound to VALU-bound there).
    x = x_ref[...].astype(compute_dtype)
    y = 1.7159 * jnp.tanh(0.666 * x)
    o_ref[...] = y.astype(o_ref.dtype)


def lecun(x: jax.Array, *, min_pallas_bytes: int = _SMALL_FASTPATH_BYTES) -> jax.Array:
    """Applies y = 1.7159 * tanh(0.666 * x) elementwise."""
    dtype = x.dtype
    if not jnp.issubdtype(dtype, jnp.floating):
        raise TypeError(f"lecun expects a floating-point input, got {dtype}")

    n = x.size
    itemsize = jnp.dtype(dtype).itemsize

    # Fast / fallback path: tiny inputs (launch overhead dominates), empty
    # inputs, and lane-misaligned flat lengths.  XLA's fused elementwise is at
    # the HBM roofline for this mem-bound op, so this path is never slower and
    # avoids any pad / slice whole-array copies.
    # TODO(synk): an in-kernel masked tail store (scalar-prefetched n) would
    # let lane-misaligned sizes use the Pallas path as well.
    if n == 0 or n * itemsize < min_pallas_bytes or n % _LANES != 0:
        return 1.7159 * jnp.tanh(0.666 * x)

    # Generation-aware tuning.
    gen = _tpu_generation()
    if gen == 0 or gen <= 5:
        block_bytes, native_half = 1 << 20, False   # <=v5e: 16 MiB scoped VMEM, no bf16 EUP
    elif gen == 6:
        block_bytes, native_half = 2 << 20, True
    else:
        block_bytes, native_half = 4 << 20, True    # v7x+: 3.2 TB/s HBM, 32 MiB scoped VMEM

    compute_dtype = dtype if (native_half and dtype == jnp.bfloat16) else jnp.float32

    # Dtype-aware sublane minimum: 8 (f32), 16 (bf16/f16), 32 (fp8/int8).
    sublane = max(8, 32 // itemsize)
    rows = n // _LANES

    # Rows per block from the byte budget, rounded down to a sublane multiple.
    target_rows = max(sublane, (block_bytes // (_LANES * itemsize)) // sublane * sublane)

    if rows <= sublane:
        # One block that exactly matches the array (allowed even when `rows`
        # is not a multiple of the sublane count).
        tr = rows
    else:
        # Prefer >= _MIN_BLOCKS grid steps so DMA pipelining and v7x dual-TC
        # sharding stay engaged even for mid-size inputs; never exceed the
        # byte-budget block, never go below one sublane tile.
        per_block = _cdiv(_cdiv(rows, _MIN_BLOCKS), sublane) * sublane
        tr = max(sublane, min(target_rows, per_block))

    grid = (_cdiv(rows, tr),)   # last block may be partial; Pallas masks it.

    x2d = x.reshape(rows, _LANES)   # zero-copy lane-dense view

    cost = pl.CostEstimate(
        flops=2 * n,
        transcendentals=n,
        bytes_accessed=2 * n * itemsize,
    )

    out2d = pl.pallas_call(
        functools.partial(_lecun_kernel, compute_dtype=compute_dtype),
        out_shape=jax.ShapeDtypeStruct((rows, _LANES), dtype),
        grid_spec=pltpu.PrefetchScalarGridSpec(
            num_scalar_prefetch=0,
            grid=grid,
            in_specs=[pl.BlockSpec((tr, _LANES), lambda i: (i, 0))],
            out_specs=pl.BlockSpec((tr, _LANES), lambda i: (i, 0)),
        ),
        compiler_params=pltpu.CompilerParams(
            dimension_semantics=("parallel",),
        ),
        cost_estimate=cost,
    )(x2d)

    return out2d.reshape(x.shape)


def lecun_ref(x: jax.Array) -> jax.Array:
    return 1.7159 * jnp.tanh(0.666 * x)


if __name__ == "__main__":
    key = jax.random.PRNGKey(0)

    # Small NCHW input consistent with typical module usage (2048 elements =
    # 16 lane-rows).  Force the Pallas path so the kernel itself is exercised.
    x = jax.random.normal(key, (2, 4, 16, 16), dtype=jnp.float32)
    y = lecun(x, min_pallas_bytes=0)
    jax.block_until_ready(y)
    y_ref = lecun_ref(x)
    assert y.shape == x.shape and y.dtype == x.dtype
    assert jnp.allclose(y, y_ref, atol=1e-5, rtol=1e-5), "pallas path mismatch"

    # Public API on the same input (small-size fast path).
    y_fast = lecun(x)
    jax.block_until_ready(y_fast)
    assert jnp.allclose(y_fast, y_ref, atol=1e-5, rtol=1e-5), "fast path mismatch"

    # Ragged row count through the kernel (120 rows, blocks of 32 -> partial
    # last block exercises Pallas' masked tail handling, no pad/slice copies).
    x_ragged = jax.random.normal(jax.random.PRNGKey(1), (3, 40, 128), dtype=jnp.float32)
    y_ragged = lecun(x_ragged, min_pallas_bytes=0)
    jax.block_until_ready(y_ragged)
    assert jnp.allclose(y_ragged, lecun_ref(x_ragged), atol=1e-5, rtol=1e-5), \
        "ragged-rows pallas path mismatch"

    # Lane-misaligned flat length (385 elements) -> jnp fallback path.
    x_odd = jax.random.normal(jax.random.PRNGKey(2), (5, 7, 11), dtype=jnp.float32)
    y_odd = lecun(x_odd)
    jax.block_until_ready(y_odd)
    assert jnp.allclose(y_odd, lecun_ref(x_odd), atol=1e-5, rtol=1e-5), \
        "misaligned fallback mismatch"

    # bf16 through the kernel (native bf16 compute on v6e/v7x, f32 on <=v5e).
    x_bf16 = jax.random.normal(jax.random.PRNGKey(3), (4, 64, 128), dtype=jnp.bfloat16)
    y_bf16 = lecun(x_bf16, min_pallas_bytes=0)
    jax.block_until_ready(y_bf16)
    assert y_bf16.dtype == jnp.bfloat16
    assert jnp.allclose(y_bf16.astype(jnp.float32),
                        lecun_ref(x_bf16).astype(jnp.float32),
                        atol=5e-2, rtol=5e-2), "bf16 pallas path mismatch"

    print("KERNEL_OK")
</pallas_src>

<mosaic_0001>
module attributes {stable_mosaic.version = 11 : i64} {
  func.func @_lecun_kernel(%arg0: i32, %arg1: memref<8x128xf32, #tpu.memory_space<vmem>>, %arg2: memref<8x128xf32, #tpu.memory_space<vmem>>) attributes {dimension_semantics = [#tpu.dimension_semantics<parallel>], iteration_bounds = array<i64: 2>, scalar_prefetch = 0 : i64, scratch_operands = 0 : i64, tpu.core_type = #tpu.core_type<tc>, window_params = [{transform_indices = @transform_0, window_bounds = array<i64: 8, 128>}, {transform_indices = @transform_1, window_bounds = array<i64: 8, 128>}]} {
    %c0 = arith.constant 0 : index
    %c0_0 = arith.constant 0 : index
    %0 = vector.load %arg1[%c0, %c0_0] : memref<8x128xf32, #tpu.memory_space<vmem>>, vector<8x128xf32>
    %cst = arith.constant 6.660000e-01 : f32
    %1 = vector.broadcast %cst : f32 to vector<8x128xf32>
    %2 = arith.mulf %1, %0 : vector<8x128xf32>
    %3 = math.tanh %2 : vector<8x128xf32>
    %cst_1 = arith.constant 1.715900e+00 : f32
    %4 = vector.broadcast %cst_1 : f32 to vector<8x128xf32>
    %5 = arith.mulf %4, %3 : vector<8x128xf32>
    %c0_2 = arith.constant 0 : index
    %c0_3 = arith.constant 0 : index
    %6 = vector.load %arg2[%c0_2, %c0_3] : memref<8x128xf32, #tpu.memory_space<vmem>>, vector<8x128xf32>
    tpu.vector_store %arg2[%c0_2, %c0_3], %5 {strides = array<i32>} : memref<8x128xf32, #tpu.memory_space<vmem>>, vector<8x128xf32>,
    return
  }
  func.func @transform_0(%arg0: i32) -> (i32, i32) {
    %c0_i32 = arith.constant 0 : i32
    %c0_i32_0 = arith.constant 0 : i32
    return %arg0, %c0_i32 : i32, i32
  }
  func.func @transform_1(%arg0: i32) -> (i32, i32) {
    %c0_i32 = arith.constant 0 : i32
    %c0_i32_0 = arith.constant 0 : i32
    return %arg0, %c0_i32 : i32, i32
  }
}

</mosaic_0001>

<bundles_post_ra>
// kernel: tpu_custom_call.1
= control target key start
LH: loop header
LB: loop body
LE: loop exit
PB: predicated region body
PF: predicated region fallthrough
CT: control target
= control target key end

     0   :  { %6 = vsyncpa [#allocation3], 0  ;;  %s552_s0 = inlined_call_operand.hbm [shape: f32[16,128], index: 0, kind: input, shape index: {}]   ;;  %s553_s1 = inlined_call_operand.hbm [shape: f32[16,128], index: 1, kind: output, shape index: {}]  }
   0x1   :  { %8 = vsyncpa [#allocation3 + $0x1], 0 }
   0x2   :  { %9 = vsyncpa [#allocation4], 0 }
   0x3   :  { %11 = vsyncpa [#allocation4 + $0x1], 0  ;;  %s391_s6 = smov 0   ;;  %s393_s7 = smov 0  }
   0x4   :  { %s395_s8 = smov 0   ;;  %s397_s9 = smov 0  }
   0x5 LB: > { %s412_s10 = sadd.s32 4294967295, %s377_s9   ;;  %s221_s11 = sadd.s32 4294967294, %s377_s9   ;;  %s377_s9 = sphi %s397_s9, %s568_s9   ;;  %s373_s8 = sphi %s395_s8, %s567_s8   ;;  %s369_s7 = sphi %s393_s7, %s566_s7   ;;  %s365_s6 = sphi %s391_s6, %s565_s6  }
   0x6   : > { %s416_s12 = sadd.s32 1, %s377_s9   ;;  %s24_s13 = sadd.s32 1, %s373_s8 }
   0x7   : > { %s21_s14 = ssub.s32 %s377_s9, %s416_s12  ;;  %p31_p0 = scmp.ne.s32.totalorder %s373_s8, %s369_s7 }
   0x8   : > { %p22_p1 = scmp.eq.s32.totalorder %s21_s14, 0  ;;  %p32_p2 = scmp.eq.s32.totalorder %s377_s9, 0 }
   0x9   : > { %p37_p3 = scmp.ne.s32.totalorder %s369_s7, %s365_s6  ;;  %p38_p4 = scmp.eq.s32.totalorder %s412_s10, 0 }
   0xa   : > { %s428_s15 = scalar_select %p22_p1, %s373_s8, %s24_s13  }
   0xb   : > { %p430_p5 = por %p32_p2, %p31_p0  ;;  %p434_p6 = por %p38_p4, %p37_p3 }
   0xc   : > { %p61_p7 = scmp.eq.s32.totalorder %s412_s10, 1  ;;  %p67_p8 = scmp.eq.s32.totalorder %s221_s11, 1 }
   0xd   : > { %p245_p10 = scmp.lt.s32.totalorder %s377_s9, 2  ;;  %s87_s20 = sand.u32 1, %s373_s8  }
   0xe   : > { %p441_p11 = por %p61_p7, %p31_p0  ;;  %p445_p12 = por %p67_p8, %p37_p3 }
   0xf   : > { %s225_s21 = sshll.u32 %s377_s9, 7  ;;  %s224_s22 = sshll.u32 %s87_s20, 3 }
  0x10   : > { %s557_s18 = scalar_select %p441_p11, 1, 0 }
  0x11   : > { %s558_s19 = scalar_select %p445_p12, 1, 0 }
  0x12   : > { %s454_s25 = scalar_lea.hbm %s552_s0, %s225_s21  ;;  %s91_s26 = scalar_lea.vmem [#allocation2], %s224_s22 }
  0x13   : > { %s98_s27 = sshll.u32 %s91_s26, 4  ;;  %p458_p13 = pnand %p245_p10, %p430_p5  ;;  %s462_s27 = int_to_ptr.vmem [resolvable:$true] %s98_s27 }
  0x14   : > { %s88_s29 = scalar_lea.sflag [#allocation3], %s87_s20  ;;  %s281_s30 = scalar_lea.hbm %s454_s25, 128 }
  0x15   : > { %p282_p2 = scmp.ne.s32.totalorder %s454_s25, %s281_s30  ;;  %p283_p3 = pneg %p458_p13 }
  0x16   : > { %s286_s4 = scalar_lea.hbm %s552_s0, 256  ;;  %p287_p5 = scmp.lt.u32.totalorder %s454_s25, %s552_s0 }
  0x17   : > { %p284_p4 = pnand %p283_p3, %p282_p2  ;;  %p288_p8 = scmp.lt.u32.totalorder %s286_s4, %s281_s30 }
  0x18   : > { %p290_p9 = scmp.lt.u32.totalorder %s281_s30, %s454_s25 }
  0x19   : > { %p285_p7 = pneg %p284_p4  ;;  %p289_p10 = por %p288_p8, %p287_p5 }
  0x1b   : > { %p291_p0 = por %p290_p9, %p289_p10 }
  0x1d   : > { %p292_p1 = pnand %p291_p0, %p285_p7 }
  0x1f   : > { %295 = shalt.err (!%p292_p1)
}
  0x20   : > { %s296_s13 = scalar_lea.vmem %s462_s27, 128  ;;  %s379_s14 = smov [#allocation2]  }
  0x21   : > { %p297_p2 = scmp.ne.s32.totalorder %s462_s27, %s296_s13  ;;  %s301_s16 = sshll.u32 %s379_s14, 4  ;;  %s302_s16 = int_to_ptr.vmem [resolvable:$false] %s301_s16 }
  0x22   : > { %s303_s20 = scalar_lea.vmem %s302_s16, 256  ;;  %p304_p11 = scmp.lt.s32.totalorder %s462_s27, %s302_s16 }
  0x23   : > { %p299_p4 = pnand %p297_p2, %p283_p3  ;;  %p305_p5 = scmp.lt.s32.totalorder %s303_s20, %s296_s13 }
  0x25   : > { %p300_p12 = pneg %p299_p4  ;;  %p306_p8 = por %p305_p5, %p304_p11 }
  0x27   : > { %p307_p9 = pnand %p306_p8, %p300_p12 }
  0x29   : > { %310 = shalt.err (!%p307_p9)
}
  0x2a   : > { %240 = dma.hbm_to_vmem [thread:$0]  (!%p458_p13), %s454_s25, 128, %s462_s27, %s88_s29  }
  0x2b   : > { %p560_p0 = scmp.lt.s32.totalorder %s377_s9, 3  ;;  %p561_p1 = scmp.ge.s32.totalorder %s377_s9, 1 }
  0x2d   : > { %p104_p3 = pnand %p561_p1, %p560_p0 }
  0x2e   : > { %s496_s21 = sand.u32 (!%p104_p3), 1, %s369_s7  }
  0x2f   : > { %107 = sbr.rel (%p104_p3) target bundleno = 85 (0x55), region = 24  ;;  %s227_s22 = sshll.u32 (!%p104_p3), %s496_s21, 3 }
  0x30   : > { %s110_s23 = scalar_lea.sflag (!%p104_p3), [#allocation3], %s496_s21  ;;  %s113_s24 = scalar_lea.vmem (!%p104_p3), [#allocation2], %s227_s22 }
  0x36   : > { %356 = dma.done.wait (%p434_p6), %s110_s23, 128  }
  0x37   : > { %358 = vsyncadd (%p434_p6), %s110_s23, 4294967168  ;;  %v132_v0 = vld [vmem:[%s113_s24] sm:$0xff]  ;;  %s131_s25 = scalar_lea.vmem [#allocation5], %s227_s22  ;;  %s230_s27 = sshll.u32 %s412_s10, 7 }
  0x38   : > { %v133_v1 = vmul.f32 0.666, %v132_v0  ;;  %s151_s26 = sshll.u32 %s131_s25, 4  ;;  %s510_s17 = scalar_lea.hbm %s553_s1, %s230_s27  ;;  %s505_s26 = int_to_ptr.vmem [resolvable:$true] %s151_s26 }
  0x39   : > { %s138_s30 = scalar_lea.sflag [#allocation4], %s496_s21  ;;  %s311_s2 = scalar_lea.vmem %s505_s26, 128 }
  0x3a   : > { %279 = vtanh.f32 %v133_v1  ;;  %p312_p6 = scmp.ne.s32.totalorder %s505_s26, %s311_s2  ;;  %p562_p11 = scmp.ne.s32.totalorder %s557_s18, 0 }
  0x3b   : > { %s380_s10 = smov [#allocation5]  }
  0x3c   : > { %p313_p12 = pnand %p312_p6, %p562_p11  ;;  %s315_s3 = sshll.u32 %s380_s10, 4  ;;  %s316_s3 = int_to_ptr.vmem [resolvable:$false] %s315_s3 }
  0x3d   : > { %s317_s4 = scalar_lea.vmem %s316_s3, 256  ;;  %p318_p7 = scmp.lt.s32.totalorder %s505_s26, %s316_s3 }
  0x3e   : > { %p314_p13 = pneg %p313_p12  ;;  %p319_p10 = scmp.lt.s32.totalorder %s317_s4, %s311_s2 }
  0x40   : > { %p320_p2 = por %p319_p10, %p318_p7 }
  0x42   : > { %p321_p4 = pnand %p320_p2, %p314_p13 }
  0x44   : > { %v280_v2 = vpop.eup %279 }
  0x45   : > { %v135_v3 = vmul.f32 1.7159, %v280_v2 }
  0x47   : > { %136 = vst [vmem:[%s131_s25] sm:$0xff] %v135_v3 }
  0x48   : > { %324 = shalt.err (!%p321_p4)
}
  0x49   : > { %s325_s5 = scalar_lea.hbm %s510_s17, 128  ;;  %s329_s14 = scalar_lea.hbm %s553_s1, 256 }
  0x4a   : > { %p326_p5 = scmp.ne.s32.totalorder %s510_s17, %s325_s5  ;;  %p330_p0 = scmp.lt.u32.totalorder %s510_s17, %s553_s1 }
  0x4b   : > { %p331_p1 = scmp.lt.u32.totalorder %s329_s14, %s325_s5  ;;  %p333_p6 = scmp.lt.u32.totalorder %s325_s5, %s510_s17 }
  0x4c   : > { %p327_p8 = pnand %p326_p5, %p562_p11 }
  0x4d   : > { %p332_p3 = por %p331_p1, %p330_p0 }
  0x4e   : > { %p328_p9 = pneg %p327_p8 }
  0x4f   : > { %p334_p12 = por %p333_p6, %p332_p3 }
  0x51   : > { %p335_p13 = pnand %p334_p12, %p328_p9 }
  0x53   : > { %338 = shalt.err (!%p335_p13)
}
  0x54   : > { %235 = dma.vmem_to_hbm [thread:$0]  (%p562_p11), %s505_s26, 128, %s510_s17, %s138_s30  }
  0x55 PF: > { %s163_s21 = sand.u32 1, %s365_s6   ;;  %p563_p7 = scmp.ne.s32.totalorder %s558_s19, 0 }
  0x56   : > { %p564_p10 = scmp.ge.s32.totalorder %s377_s9, 2  ;;  %s164_s22 = scalar_lea.sflag [#allocation4], %s163_s21 }
  0x58   : > { %p242_p2 = pnand %p564_p10, %p563_p7 }
  0x5a   : > { %360 = dma.done.wait (!%p242_p2), %s164_s22, 128  }
  0x5b   : > { %362 = vsyncadd (!%p242_p2), %s164_s22, 4294967168  ;;  %p14_p4 = scmp.ge.s32.totalorder %s416_s12, 4   ;;  %s565_s6 = smov %s369_s7 }
  0x5c   : > { %s566_s7 = smov %s373_s8  ;;  %s567_s8 = smov %s428_s15 }
  0x5d   : > { %s568_s9 = smov %s416_s12  ;;  %16 = sbr.rel (!%p14_p4) target bundleno = 5 (0x5), region = 69 }
  0x64   :  { %169 = vsyncpa [#allocation3], 1 }
  0x65   :  { %171 = vsyncpa [#allocation3 + $0x1], 1 }
  0x66   :  { %172 = vsyncpa [#allocation4], 1 }
  0x67   :  { %174 = vsyncpa [#allocation4 + $0x1], 1 }

</bundles_post_ra>
